<compile_context>
chip_gen: v5e
topology: v5e:2x2
jax: 0.10.0
libtpu: 0.0.40
codegen_flags: <defaults>
</compile_context>

<pallas_src>
import jax
import jax.numpy as jnp
from jax.experimental import pallas as pl
from jax.experimental.pallas import tpu as pltpu


# ----------------------- config (small, consistent with module) -----------------------
MMFN_config = {
    "SWIN_size": 128,
    "CLIP_size": 128,
    "SWIN_max_length": 8,
}
HIDDEN1 = 512   # fixed by module definition
HIDDEN2 = 256   # fixed by module definition
_MAX_TB = 512   # batch rows per grid step for large B (8-aligned, ~85% HBM roofline)


# ----------------------------------- Pallas kernel ------------------------------------
def mmfn_visual_kernel(swin_ref, clip_ref, w_rep_ref, w_clip_ref, bf_ref, out_ref):
    # swin_ref : [TB, L*S] bf16   (native layout, seq-mean folded into w_rep)
    # clip_ref : [TB, C]   bf16
    # w_rep_ref: [L*S, 256] bf16, w_clip_ref: [C, 256] bf16, bf_ref: [1, 256] f32
    acc = jnp.dot(swin_ref[...], w_rep_ref[...], preferred_element_type=jnp.float32)
    acc = acc + jnp.dot(clip_ref[...], w_clip_ref[...], preferred_element_type=jnp.float32)
    out_ref[...] = (acc + bf_ref[...]).astype(out_ref.dtype)


# -------------------------- parameter fusion (prep-time, exact) ------------------------
def fuse_params(params, seq_len, weight_dtype=jnp.bfloat16):
    """Fold 3 activation-free Linears + the 1/L mean + seq replication into one map."""
    w1, b1, w2, b2, w3, b3 = params
    S = MMFN_config["SWIN_size"]
    wf = (w1 @ w2) @ w3                              # [S+C, HIDDEN2]
    bf = ((b1 @ w2) + b2) @ w3 + b3                  # [1, HIDDEN2]
    wf_swin = wf[:S, :] * (1.0 / float(seq_len))     # fold the mean's 1/L
    wf_clip = wf[S:, :]
    # Row l*S + s of w_rep equals wf_swin[s], matching swin.reshape(B, L*S) row-major
    # flattening, so the seq-mean becomes part of a single [B, L*S] @ [L*S, 256] matmul.
    w_rep = jnp.tile(wf_swin, (seq_len, 1))          # [L*S, HIDDEN2]
    return w_rep.astype(weight_dtype), wf_clip.astype(weight_dtype), bf.astype(jnp.float32)


# ------------------------------------- wrapper ----------------------------------------
def mmfn_semi_visual_branch(inputs_swin, inputs_clip, fused_params):
    """inputs_swin: [B, L, S], inputs_clip: [B, C], fused_params: (w_rep, w_clip, bf)."""
    w_rep, w_clip, bf = fused_params
    B, L, S = inputs_swin.shape
    C = inputs_clip.shape[1]
    K = L * S
    in_dtype = w_rep.dtype

    # [B, L, S] -> [B, L*S]: contiguous reshape, no transpose, no extra HBM pass.
    swin_flat = inputs_swin.reshape(B, K).astype(in_dtype)
    clip = inputs_clip.astype(in_dtype)

    # Batch tiling: small B -> one full-array block (block == full dim is always legal);
    # large B -> 8-aligned tiles of _MAX_TB rows; ragged last tile uses Pallas partial
    # blocks (no input padding, partial output store is masked).
    # TODO(synk): at tiny B (e.g. the demo B=4) fixed pallas_call overhead dominates and
    # plain XLA fusion would be just as fast; this kernel targets B in the hundreds+.
    TB = B if B <= _MAX_TB else _MAX_TB
    n_tiles = pl.cdiv(B, TB)

    flops = 2 * B * (K + C) * HIDDEN2
    bytes_accessed = int(
        swin_flat.size * swin_flat.dtype.itemsize
        + clip.size * clip.dtype.itemsize
        + w_rep.size * w_rep.dtype.itemsize
        + w_clip.size * w_clip.dtype.itemsize
        + bf.size * bf.dtype.itemsize
        + B * HIDDEN2 * 4
    )

    out = pl.pallas_call(
        mmfn_visual_kernel,
        out_shape=jax.ShapeDtypeStruct((B, HIDDEN2), jnp.float32),
        grid_spec=pltpu.PrefetchScalarGridSpec(
            num_scalar_prefetch=0,
            grid=(n_tiles,),
            in_specs=[
                pl.BlockSpec((TB, K), lambda i: (i, 0)),           # swin rows, lane-dense
                pl.BlockSpec((TB, C), lambda i: (i, 0)),           # clip rows
                # Constant block index -> weights/bias stay VMEM-resident across steps.
                pl.BlockSpec((K, HIDDEN2), lambda i: (0, 0)),
                pl.BlockSpec((C, HIDDEN2), lambda i: (0, 0)),
                pl.BlockSpec((1, HIDDEN2), lambda i: (0, 0)),
            ],
            out_specs=pl.BlockSpec((TB, HIDDEN2), lambda i: (i, 0)),
        ),
        compiler_params=pltpu.CompilerParams(
            # Batch axis is independent -> parallel (v7x shards it over its 2 TCs).
            dimension_semantics=("parallel",),
            # Headroom above the 16/32 MiB default scoped limits so TB=512 tiles fit
            # double-buffered on v5e/v6e/v7x alike (working set is only a few MiB).
            vmem_limit_bytes=48 << 20,
        ),
        cost_estimate=pl.CostEstimate(
            flops=flops, transcendentals=0, bytes_accessed=bytes_accessed),
    )(swin_flat, clip, w_rep, w_clip, bf)

    return out


# ------------------------------ deterministic parameters ------------------------------
def init_params(key):
    """Torch-style Linear init (uniform +/- 1/sqrt(fan_in)), weights stored as [in, out]."""
    d_in = MMFN_config["SWIN_size"] + MMFN_config["CLIP_size"]
    dims = [(d_in, d_in), (d_in, HIDDEN1), (HIDDEN1, HIDDEN2)]
    params = []
    for (fan_in, fan_out) in dims:
        key, kw, kb = jax.random.split(key, 3)
        bound = 1.0 / jnp.sqrt(fan_in)
        w = jax.random.uniform(kw, (fan_in, fan_out), jnp.float32, -bound, bound)
        b = jax.random.uniform(kb, (1, fan_out), jnp.float32, -bound, bound)
        params.extend([w, b])
    return tuple(params)


# ---------------------------------- pure-JAX reference ---------------------------------
def reference_forward(inputs_swin, inputs_clip, params):
    w1, b1, w2, b2, w3, b3 = params
    avg = jnp.mean(inputs_swin, axis=1)
    x = jnp.concatenate([avg, inputs_clip], axis=1)
    x = x @ w1 + b1
    x = x @ w2 + b2
    x = x @ w3 + b3
    return x


# --------------------------------------- main ------------------------------------------
if __name__ == "__main__":
    key = jax.random.PRNGKey(0)
    k_swin, k_clip, k_params = jax.random.split(key, 3)

    B = 4
    L = MMFN_config["SWIN_max_length"]
    S = MMFN_config["SWIN_size"]
    C = MMFN_config["CLIP_size"]

    inputs_swin = jax.random.normal(k_swin, (B, L, S), jnp.float32)
    inputs_clip = jax.random.normal(k_clip, (B, C), jnp.float32)
    params = init_params(k_params)

    # Fold the 3 Linears + 1/L mean + seq replication into one affine map (bf16 weights;
    # bias and accumulator stay f32).
    fused = fuse_params(params, L, weight_dtype=jnp.bfloat16)

    # Inputs narrowed to bf16 at the caller: kernel is HBM-bound on the swin read.
    out = mmfn_semi_visual_branch(inputs_swin.astype(jnp.bfloat16),
                                  inputs_clip.astype(jnp.bfloat16),
                                  fused)
    out = jax.block_until_ready(out)

    ref = reference_forward(inputs_swin, inputs_clip, params)
    assert out.shape == (B, HIDDEN2), out.shape
    # bf16 inputs/weights + f32 re-association => looser tolerance than pure f32.
    assert jnp.allclose(out, ref, atol=2e-2, rtol=2e-2), "mismatch vs. reference"

    print("KERNEL_OK")
</pallas_src>

<mosaic_0001>
module attributes {stable_mosaic.version = 11 : i64} {
  func.func @mmfn_visual_kernel(%arg0: i32, %arg1: memref<4x1024xbf16, #tpu.memory_space<vmem>>, %arg2: memref<4x128xbf16, #tpu.memory_space<vmem>>, %arg3: memref<1024x256xbf16, #tpu.memory_space<vmem>>, %arg4: memref<128x256xbf16, #tpu.memory_space<vmem>>, %arg5: memref<1x256xf32, #tpu.memory_space<vmem>>, %arg6: memref<4x256xf32, #tpu.memory_space<vmem>>) attributes {dimension_semantics = [#tpu.dimension_semantics<parallel>], iteration_bounds = array<i64: 1>, scalar_prefetch = 0 : i64, scratch_operands = 0 : i64, tpu.core_type = #tpu.core_type<tc>, window_params = [{transform_indices = @transform_0, window_bounds = array<i64: 4, 1024>}, {transform_indices = @transform_1, window_bounds = array<i64: 4, 128>}, {pipeline_mode = #tpu.pipeline_mode<synchronous>, transform_indices = @transform_2, window_bounds = array<i64: 1024, 256>}, {pipeline_mode = #tpu.pipeline_mode<synchronous>, transform_indices = @transform_3, window_bounds = array<i64: 128, 256>}, {pipeline_mode = #tpu.pipeline_mode<synchronous>, transform_indices = @transform_4, window_bounds = array<i64: 1, 256>}, {transform_indices = @transform_5, window_bounds = array<i64: 4, 256>}]} {
    %c0 = arith.constant 0 : index
    %c0_0 = arith.constant 0 : index
    %0 = vector.load %arg1[%c0, %c0_0] : memref<4x1024xbf16, #tpu.memory_space<vmem>>, vector<4x1024xbf16>
    %c0_1 = arith.constant 0 : index
    %c0_2 = arith.constant 0 : index
    %1 = vector.load %arg3[%c0_1, %c0_2] : memref<1024x256xbf16, #tpu.memory_space<vmem>>, vector<1024x256xbf16>
    %cst = arith.constant dense<0.000000e+00> : vector<4x256xf32>
    %2 = tpu.matmul %0, %1, %cst {dimension_numbers = #tpu.dot_dimension_numbers<[1], [0], [0], [1], [0, 0, 1, 1], [], []>} : vector<4x1024xbf16>, vector<1024x256xbf16>, vector<4x256xf32> -> vector<4x256xf32>
    %c0_3 = arith.constant 0 : index
    %c0_4 = arith.constant 0 : index
    %3 = vector.load %arg2[%c0_3, %c0_4] : memref<4x128xbf16, #tpu.memory_space<vmem>>, vector<4x128xbf16>
    %c0_5 = arith.constant 0 : index
    %c0_6 = arith.constant 0 : index
    %4 = vector.load %arg4[%c0_5, %c0_6] : memref<128x256xbf16, #tpu.memory_space<vmem>>, vector<128x256xbf16>
    %cst_7 = arith.constant dense<0.000000e+00> : vector<4x256xf32>
    %5 = tpu.matmul %3, %4, %cst_7 {dimension_numbers = #tpu.dot_dimension_numbers<[1], [0], [0], [1], [0, 0, 1, 1], [], []>} : vector<4x128xbf16>, vector<128x256xbf16>, vector<4x256xf32> -> vector<4x256xf32>
    %6 = arith.addf %2, %5 : vector<4x256xf32>
    %c0_8 = arith.constant 0 : index
    %c0_9 = arith.constant 0 : index
    %7 = vector.load %arg5[%c0_8, %c0_9] : memref<1x256xf32, #tpu.memory_space<vmem>>, vector<1x256xf32>
    %8 = vector.broadcast %7 : vector<1x256xf32> to vector<4x256xf32>
    %9 = arith.addf %6, %8 : vector<4x256xf32>
    %c0_10 = arith.constant 0 : index
    %c0_11 = arith.constant 0 : index
    %10 = vector.load %arg6[%c0_10, %c0_11] : memref<4x256xf32, #tpu.memory_space<vmem>>, vector<4x256xf32>
    tpu.vector_store %arg6[%c0_10, %c0_11], %9 {strides = array<i32>} : memref<4x256xf32, #tpu.memory_space<vmem>>, vector<4x256xf32>,
    return
  }
  func.func @transform_0(%arg0: i32) -> (i32, i32) {
    %c0_i32 = arith.constant 0 : i32
    %c0_i32_0 = arith.constant 0 : i32
    return %arg0, %c0_i32 : i32, i32
  }
  func.func @transform_1(%arg0: i32) -> (i32, i32) {
    %c0_i32 = arith.constant 0 : i32
    %c0_i32_0 = arith.constant 0 : i32
    return %arg0, %c0_i32 : i32, i32
  }
  func.func @transform_2(%arg0: i32) -> (i32, i32) {
    %c0_i32 = arith.constant 0 : i32
    %c0_i32_0 = arith.constant 0 : i32
    %c0_i32_1 = arith.constant 0 : i32
    return %c0_i32, %c0_i32_0 : i32, i32
  }
  func.func @transform_3(%arg0: i32) -> (i32, i32) {
    %c0_i32 = arith.constant 0 : i32
    %c0_i32_0 = arith.constant 0 : i32
    %c0_i32_1 = arith.constant 0 : i32
    return %c0_i32, %c0_i32_0 : i32, i32
  }
  func.func @transform_4(%arg0: i32) -> (i32, i32) {
    %c0_i32 = arith.constant 0 : i32
    %c0_i32_0 = arith.constant 0 : i32
    %c0_i32_1 = arith.constant 0 : i32
    return %c0_i32, %c0_i32_0 : i32, i32
  }
  func.func @transform_5(%arg0: i32) -> (i32, i32) {
    %c0_i32 = arith.constant 0 : i32
    %c0_i32_0 = arith.constant 0 : i32
    return %arg0, %c0_i32 : i32, i32
  }
}

</mosaic_0001>

<bundles_post_ra>
// kernel: tpu_custom_call.1
= control target key start
LH: loop header
LB: loop body
LE: loop exit
PB: predicated region body
PF: predicated region fallthrough
CT: control target
= control target key end

     0   :  { %10 = vsyncpa [#allocation3], 0  ;;  %s2178_s0 = inlined_call_operand.hbm [shape: bf16[4,1024], index: 0, kind: input, shape index: {}]   ;;  %s2179_s1 = inlined_call_operand.hbm [shape: bf16[4,128], index: 1, kind: input, shape index: {}]   ;;  %s2180_s2 = inlined_call_operand.hbm [shape: bf16[1024,256], index: 2, kind: input, shape index: {}]   ;;  %s2181_s3 = inlined_call_operand.hbm [shape: bf16[128,256], index: 3, kind: input, shape index: {}]   ;;  %s2182_s4 = inlined_call_operand.vmem [shape: f32[1,256], index: 4, kind: input, shape index: {}]   ;;  %s2183_s5 = inlined_call_operand.hbm [shape: f32[4,256], index: 5, kind: output, shape index: {}]  }
   0x1   :  { %11 = vsyncpa [#allocation6], 0 }
   0x2   :  { %12 = vsyncpa [#allocation9], 0  ;;  %s30_s20 = sshll.u32 %s2179_s1, 4  ;;  %s31_s20 = int_to_ptr.hbm [resolvable:$true] %s30_s20 }
   0x3   :  { %13 = vsyncpa [#allocation4], 0  ;;  %s2091_s21 = smov [#allocation5]   ;;  %s19_s25 = sshll.u32 %s2178_s0, 4  ;;  %s20_s25 = int_to_ptr.hbm [resolvable:$true] %s19_s25 }
   0x4   :  { %s32_s22 = sshll.u32 %s2091_s21, 4  ;;  %s2092_s26 = smov [#allocation2]   ;;  %s33_s22 = int_to_ptr.vmem [resolvable:$true] %s32_s22 }
   0x5   :  { %35 = dma.hbm_to_vmem [thread:$0]  %s31_s20, 32, %s33_s22, [#allocation6]  }
   0x6   :  { %s21_s27 = sshll.u32 %s2092_s26, 4  ;;  %s40_s30 = sshll.u32 %s2180_s2, 4  ;;  %s22_s27 = int_to_ptr.vmem [resolvable:$true] %s21_s27  ;;  %s41_s30 = int_to_ptr.hbm [resolvable:$true] %s40_s30 }
   0x7   :  { %24 = dma.hbm_to_vmem [thread:$0]  %s20_s25, 256, %s22_s27, [#allocation3]  }
   0x8   :  { %s2093_s1 = smov [#allocation7]   ;;  %s53_s9 = sshll.u32 %s2181_s3, 4  ;;  %s54_s9 = int_to_ptr.hbm [resolvable:$true] %s53_s9 }
   0x9   :  { %s42_s6 = sshll.u32 %s2093_s1, 4  ;;  %s2094_s10 = smov 128   ;;  %s43_s6 = int_to_ptr.vmem [resolvable:$true] %s42_s6 }
   0xa   :  { %s2095_s0 = smov 8   ;;  %s2096_s11 = smov [#allocation8]  }
   0xb   :  { %48 = dma.hbm_to_vmem [thread:$0]  %s41_s30, 16384, %s43_s6, [#allocation6], %s2094_s10, %s2094_s10, %s2095_s0  }
   0xc   :  { %s55_s12 = sshll.u32 %s2096_s11, 4  ;;  %s56_s12 = int_to_ptr.vmem [resolvable:$true] %s55_s12 }
   0xd   :  { %61 = dma.hbm_to_vmem [thread:$0]  %s54_s9, 2048, %s56_s12, [#allocation9], %s2094_s10, %s2094_s10, %s2095_s0  }
   0xe   :  { %2083 = dma.done.wait [#allocation3], 256  }
   0xf   :  { %2084 = vsyncadd [#allocation3], 4294967040 }
  0x10   :  { %2085 = dma.done.wait [#allocation6], 16416  }
  0x11   :  { %2086 = vsyncadd [#allocation6], 4294950880 }
  0x12   :  { %2087 = dma.done.wait [#allocation9], 2048  }
  0x13   :  { %2088 = vsyncadd [#allocation9], 4294965248  ;;  %v1294_v0 = vld [vmem:[#allocation8 + $0x70] sm:$0xf]  ;;  %v1955_v1 = vld [vmem:[#allocation8 + $0x74] sm:$0xf0] }
  0x14   :  { %v1954_v2 = vld [vmem:[#allocation8 + $0x74] sm:$0xf]  ;;  %v1295_v3 = vor.u32 %v1955_v1, %v1294_v0  ;;  %v1296_v4 = vld [vmem:[#allocation8 + $0x78] sm:$0xf0]  ;;  %v1358_v5 = vld [vmem:[#allocation7 + $0x70] sm:$0xf] }
  0x15   :  { %v1827_v6 = vld [vmem:[#allocation7 + $0x74] sm:$0xf0]  ;;  %v1299_v7 = vor.u32 %v1954_v2, %v1296_v4  ;;  %v1422_v9 = vld [vmem:[#allocation7 + $0xf0] sm:$0xf]  ;;  %v1286_v11 = vld [vmem:[#allocation8 + $0x60] sm:$0xf] }
  0x16   :  { %v1359_v8 = vor.u32 %v1827_v6, %v1358_v5  ;;  %v1843_v10 = vld [vmem:[#allocation7 + $0xf4] sm:$0xf0]  ;;  %307 = vmatpush.bf16.msra.mxu0 %v1295_v3  ;;  %v1953_v13 = vld [vmem:[#allocation8 + $0x64] sm:$0xf0]  ;;  %v1952_v14 = vld [vmem:[#allocation8 + $0x64] sm:$0xf] }
  0x17   :  { %v1423_v12 = vor.u32 %v1843_v10, %v1422_v9  ;;  %v1288_v15 = vld [vmem:[#allocation8 + $0x68] sm:$0xf0]  ;;  %320 = vmatpush.bf16.msra.mxu1 %v1299_v7  ;;  %v1287_v16 = vor.u32 %v1953_v13, %v1286_v11  ;;  %v1350_v18 = vld [vmem:[#allocation7 + $0x60] sm:$0xf]  ;;  %v1825_v19 = vld [vmem:[#allocation7 + $0x64] sm:$0xf0] }
  0x18   :  { %994 = vmatpush.bf16.msra.mxu2 %v1359_v8  ;;  %v1291_v17 = vor.u32 %v1952_v14, %v1288_v15  ;;  %v1414_v20 = vld [vmem:[#allocation7 + $0xe0] sm:$0xf]  ;;  %v1351_v21 = vor.u32 %v1825_v19, %v1350_v18  ;;  %v1841_v22 = vld [vmem:[#allocation7 + $0xe4] sm:$0xf0]  ;;  %v1278_v23 = vld [vmem:[#allocation8 + $0x50] sm:$0xf] }
  0x19   :  { %1007 = vmatpush.bf16.msra.mxu3 %v1423_v12  ;;  %v1951_v24 = vld [vmem:[#allocation8 + $0x54] sm:$0xf0]  ;;  %v1415_v25 = vor.u32 %v1841_v22, %v1414_v20  ;;  %v1950_v26 = vld [vmem:[#allocation8 + $0x54] sm:$0xf]  ;;  %v1280_v27 = vld [vmem:[#allocation8 + $0x58] sm:$0xf0] }
  0x1a   :  { %v1342_v28 = vld [vmem:[#allocation7 + $0x50] sm:$0xf]  ;;  %308 = vmatpush.bf16.msra.mxu0 %v1287_v16  ;;  %v1279_v29 = vor.u32 %v1951_v24, %v1278_v23  ;;  %v1823_v30 = vld [vmem:[#allocation7 + $0x54] sm:$0xf0]  ;;  %v1283_v33 = vor.u32 %v1950_v26, %v1280_v27  ;;  %v1270_v35 = vld [vmem:[#allocation8 + $0x40] sm:$0xf] }
  0x1b   :  { %v1406_v31 = vld [vmem:[#allocation7 + $0xd0] sm:$0xf]  ;;  %v1839_v32 = vld [vmem:[#allocation7 + $0xd4] sm:$0xf0]  ;;  %321 = vmatpush.bf16.msra.mxu1 %v1291_v17  ;;  %v1343_v34 = vor.u32 %v1823_v30, %v1342_v28  ;;  %v1949_v36 = vld [vmem:[#allocation8 + $0x44] sm:$0xf0] }
  0x1c   :  { %995 = vmatpush.bf16.msra.mxu2 %v1351_v21  ;;  %v1948_v37 = vld [vmem:[#allocation8 + $0x44] sm:$0xf]  ;;  %v1407_v38 = vor.u32 %v1839_v32, %v1406_v31  ;;  %v1272_v39 = vld [vmem:[#allocation8 + $0x48] sm:$0xf0]  ;;  %v1334_v40 = vld [vmem:[#allocation7 + $0x40] sm:$0xf]  ;;  %v1271_v44 = vor.u32 %v1949_v36, %v1270_v35 }
  0x1d   :  { %1008 = vmatpush.bf16.msra.mxu3 %v1415_v25  ;;  %v1821_v41 = vld [vmem:[#allocation7 + $0x44] sm:$0xf0]  ;;  %v1398_v42 = vld [vmem:[#allocation7 + $0xc0] sm:$0xf]  ;;  %v1275_v45 = vor.u32 %v1948_v37, %v1272_v39  ;;  %v1262_v47 = vld [vmem:[#allocation8 + $0x30] sm:$0xf] }
  0x1e   :  { %v1837_v43 = vld [vmem:[#allocation7 + $0xc4] sm:$0xf0]  ;;  %309 = vmatpush.bf16.msra.mxu0 %v1279_v29  ;;  %v1335_v46 = vor.u32 %v1821_v41, %v1334_v40  ;;  %v1947_v48 = vld [vmem:[#allocation8 + $0x34] sm:$0xf0]  ;;  %v1946_v49 = vld [vmem:[#allocation8 + $0x34] sm:$0xf] }
  0x1f   :  { %322 = vmatpush.bf16.msra.mxu1 %v1283_v33  ;;  %v1399_v50 = vor.u32 %v1837_v43, %v1398_v42  ;;  %v1264_v51 = vld [vmem:[#allocation8 + $0x38] sm:$0xf0]  ;;  %v1326_v52 = vld [vmem:[#allocation7 + $0x30] sm:$0xf]  ;;  %v1819_v53 = vld [vmem:[#allocation7 + $0x34] sm:$0xf0]  ;;  %v1263_v56 = vor.u32 %v1947_v48, %v1262_v47 }
  0x20   :  { %996 = vmatpush.bf16.msra.mxu2 %v1343_v34  ;;  %v1390_v54 = vld [vmem:[#allocation7 + $0xb0] sm:$0xf]  ;;  %v1835_v55 = vld [vmem:[#allocation7 + $0xb4] sm:$0xf0]  ;;  %v1267_v57 = vor.u32 %v1946_v49, %v1264_v51  ;;  %v1327_v58 = vor.u32 %v1819_v53, %v1326_v52  ;;  %v1254_v59 = vld [vmem:[#allocation8 + $0x20] sm:$0xf] }
  0x21   :  { %1009 = vmatpush.bf16.msra.mxu3 %v1407_v38  ;;  %v1945_v60 = vld [vmem:[#allocation8 + $0x24] sm:$0xf0]  ;;  %v1944_v61 = vld [vmem:[#allocation8 + $0x24] sm:$0xf]  ;;  %v1391_v62 = vor.u32 %v1835_v55, %v1390_v54  ;;  %v1256_v63 = vld [vmem:[#allocation8 + $0x28] sm:$0xf0] }
  0x22   :  { %310 = vmatpush.bf16.msra.mxu0 %v1271_v44  ;;  %v1318_v0 = vld [vmem:[#allocation7 + $0x20] sm:$0xf]  ;;  %v1817_v1 = vld [vmem:[#allocation7 + $0x24] sm:$0xf0]  ;;  %v1255_v4 = vor.u32 %v1945_v60, %v1254_v59  ;;  %v1259_v5 = vor.u32 %v1944_v61, %v1256_v63  ;;  %v1246_v7 = vld [vmem:[#allocation8 + $0x10] sm:$0xf] }
  0x23   :  { %323 = vmatpush.bf16.msra.mxu1 %v1275_v45  ;;  %v1382_v2 = vld [vmem:[#allocation7 + $0xa0] sm:$0xf]  ;;  %v1833_v3 = vld [vmem:[#allocation7 + $0xa4] sm:$0xf0]  ;;  %v1319_v6 = vor.u32 %v1817_v1, %v1318_v0  ;;  %v1943_v8 = vld [vmem:[#allocation8 + $0x14] sm:$0xf0] }
  0x24   :  { %997 = vmatpush.bf16.msra.mxu2 %v1335_v46  ;;  %v1942_v9 = vld [vmem:[#allocation8 + $0x14] sm:$0xf]  ;;  %v1383_v10 = vor.u32 %v1833_v3, %v1382_v2  ;;  %v1248_v11 = vld [vmem:[#allocation8 + $0x18] sm:$0xf0]  ;;  %v1310_v12 = vld [vmem:[#allocation7 + $0x10] sm:$0xf]  ;;  %v1247_v16 = vor.u32 %v1943_v8, %v1246_v7 }
  0x25   :  { %1010 = vmatpush.bf16.msra.mxu3 %v1399_v50  ;;  %v1815_v13 = vld [vmem:[#allocation7 + $0x14] sm:$0xf0]  ;;  %v1374_v14 = vld [vmem:[#allocation7 + $0x90] sm:$0xf]  ;;  %v1238_v17 = vld [vmem:[#allocation8] sm:$0xf]  ;;  %v1251_v19 = vor.u32 %v1942_v9, %v1248_v11 }
  0x26   :  { %311 = vmatpush.bf16.msra.mxu0 %v1263_v56  ;;  %v1831_v15 = vld [vmem:[#allocation7 + $0x94] sm:$0xf0]  ;;  %v1941_v18 = vld [vmem:[#allocation8 + $0x4] sm:$0xf0]  ;;  %v1311_v20 = vor.u32 %v1815_v13, %v1310_v12  ;;  %v1940_v21 = vld [vmem:[#allocation8 + $0x4] sm:$0xf] }
  0x27   :  { %324 = vmatpush.bf16.msra.mxu1 %v1267_v57  ;;  %v1240_v22 = vld [vmem:[#allocation8 + $0x8] sm:$0xf0]  ;;  %v1302_v23 = vld [vmem:[#allocation7] sm:$0xf]  ;;  %v1375_v24 = vor.u32 %v1831_v15, %v1374_v14  ;;  %v1813_v25 = vld [vmem:[#allocation7 + $0x4] sm:$0xf0]  ;;  %v1239_v31 = vor.u32 %v1941_v18, %v1238_v17 }
  0x28   :  { %998 = vmatpush.bf16.msra.mxu2 %v1327_v58  ;;  %v1486_v26 = vld [vmem:[#allocation7 + $0x170] sm:$0xf]  ;;  %v1859_v27 = vld [vmem:[#allocation7 + $0x174] sm:$0xf0]  ;;  %v1366_v33 = vld [vmem:[#allocation7 + $0x80] sm:$0xf]  ;;  %v1243_v35 = vor.u32 %v1940_v21, %v1240_v22  ;;  %v1303_v36 = vor.u32 %v1813_v25, %v1302_v23 }
  0x29   :  { %1011 = vmatpush.bf16.msra.mxu3 %v1391_v62  ;;  %v1550_v28 = vld [vmem:[#allocation7 + $0x1f0] sm:$0xf]  ;;  %v1875_v29 = vld [vmem:[#allocation7 + $0x1f4] sm:$0xf0]  ;;  %v1829_v34 = vld [vmem:[#allocation7 + $0x84] sm:$0xf0]  ;;  %v1487_v39 = vor.u32 %v1859_v27, %v1486_v26 }
  0x2a   :  { %312 = vmatpush.bf16.msra.mxu0 %v1255_v4  ;;  %v1614_v30 = vld [vmem:[#allocation7 + $0x270] sm:$0xf]  ;;  %v1891_v32 = vld [vmem:[#allocation7 + $0x274] sm:$0xf0]  ;;  %v1551_v40 = vor.u32 %v1875_v29, %v1550_v28  ;;  %v1478_v41 = vld [vmem:[#allocation7 + $0x160] sm:$0xf]  ;;  %v1367_v43 = vor.u32 %v1829_v34, %v1366_v33 }
  0x2b   :  { %325 = vmatpush.bf16.msra.mxu1 %v1259_v5  ;;  %v1678_v37 = vld [vmem:[#allocation7 + $0x2f0] sm:$0xf]  ;;  %v1907_v38 = vld [vmem:[#allocation7 + $0x2f4] sm:$0xf0]  ;;  %v1615_v42 = vor.u32 %v1891_v32, %v1614_v30  ;;  %v1857_v44 = vld [vmem:[#allocation7 + $0x164] sm:$0xf0] }
  0x2c   :  { %999 = vmatpush.bf16.msra.mxu2 %v1319_v6  ;;  %v1542_v45 = vld [vmem:[#allocation7 + $0x1e0] sm:$0xf]  ;;  %v1873_v46 = vld [vmem:[#allocation7 + $0x1e4] sm:$0xf0]  ;;  %v1679_v47 = vor.u32 %v1907_v38, %v1678_v37  ;;  %v80_v52 = vld [vmem:[#allocation2] sm:$0xff]  ;;  %v1479_v53 = vor.u32 %v1857_v44, %v1478_v41  ;;  %s2097_s13 = smov [#allocation10]  }
  0x2d   :  { %1012 = vmatpush.bf16.msra.mxu3 %v1383_v10  ;;  %v1606_v48 = vld [vmem:[#allocation7 + $0x260] sm:$0xf]  ;;  %v1889_v49 = vld [vmem:[#allocation7 + $0x264] sm:$0xf0]  ;;  %v1543_v54 = vor.u32 %v1873_v46, %v1542_v45  ;;  %v1470_v55 = vld [vmem:[#allocation7 + $0x150] sm:$0xf] }
  0x2e   :  { %313 = vmatpush.bf16.msra.mxu0 %v1247_v16  ;;  %v1670_v50 = vld [vmem:[#allocation7 + $0x2e0] sm:$0xf]  ;;  %v1905_v51 = vld [vmem:[#allocation7 + $0x2e4] sm:$0xf0]  ;;  %v1855_v56 = vld [vmem:[#allocation7 + $0x154] sm:$0xf0]  ;;  %v1607_v57 = vor.u32 %v1889_v49, %v1606_v48 }
  0x2f   :  { %326 = vmatpush.bf16.msra.mxu1 %v1251_v19  ;;  %334 = vst [vmem:[#allocation1] ss:$4 sm:$0xff] %v80_v52  ;;  %v1534_v58 = vld [vmem:[#allocation7 + $0x1d0] sm:$0xf]  ;;  %v1871_v59 = vld [vmem:[#allocation7 + $0x1d4] sm:$0xf0]  ;;  %v1671_v61 = vor.u32 %v1905_v51, %v1670_v50  ;;  %v1471_v2 = vor.u32 %v1855_v56, %v1470_v55 }
  0x30   :  { %1000 = vmatpush.bf16.msra.mxu2 %v1311_v20  ;;  %v210_v60 = vld [vmem:[#allocation5] sm:$0x3]  ;;  %v1598_v62 = vld [vmem:[#allocation7 + $0x250] sm:$0xf]  ;;  %v1887_v63 = vld [vmem:[#allocation7 + $0x254] sm:$0xf0]  ;;  %v1535_v3 = vor.u32 %v1871_v59, %v1534_v58 }
  0x31   :  { %1013 = vmatpush.bf16.msra.mxu3 %v1375_v24  ;;  %v1662_v0 = vld [vmem:[#allocation7 + $0x2d0] sm:$0xf]  ;;  %v1903_v1 = vld [vmem:[#allocation7 + $0x2d4] sm:$0xf0]  ;;  %v1462_v4 = vld [vmem:[#allocation7 + $0x140] sm:$0xf]  ;;  %v1599_v6 = vor.u32 %v1887_v63, %v1598_v62 }
  0x32   :  { %314 = vmatpush.bf16.msra.mxu0 %v1239_v31  ;;  %v1853_v5 = vld [vmem:[#allocation7 + $0x144] sm:$0xf0]  ;;  %v1526_v7 = vld [vmem:[#allocation7 + $0x1c0] sm:$0xf]  ;;  %v1663_v10 = vor.u32 %v1903_v1, %v1662_v0  ;;  %v1454_v18 = vld [vmem:[#allocation7 + $0x130] sm:$0xf] }
  0x33   :  { %327 = vmatpush.bf16.msra.mxu1 %v1243_v35  ;;  %v1869_v8 = vld [vmem:[#allocation7 + $0x1c4] sm:$0xf0]  ;;  %v1590_v9 = vld [vmem:[#allocation7 + $0x240] sm:$0xf]  ;;  %v1463_v16 = vor.u32 %v1853_v5, %v1462_v4  ;;  %v1851_v20 = vld [vmem:[#allocation7 + $0x134] sm:$0xf0] }
  0x34   :  { %1001 = vmatpush.bf16.msra.mxu2 %v1303_v36  ;;  %v1885_v11 = vld [vmem:[#allocation7 + $0x244] sm:$0xf0]  ;;  %v1654_v12 = vld [vmem:[#allocation7 + $0x2c0] sm:$0xf]  ;;  %v1527_v17 = vor.u32 %v1869_v8, %v1526_v7  ;;  %v1518_v21 = vld [vmem:[#allocation7 + $0x1b0] sm:$0xf]  ;;  %v1455_v28 = vor.u32 %v1851_v20, %v1454_v18 }
  0x35   :  { %1014 = vmatpush.bf16.msra.mxu3 %v1367_v43  ;;  %315 = vmatmul.bf16.vlgmr.msra.gmra.mxu0 %v210_v60  ;;  %v1901_v13 = vld [vmem:[#allocation7 + $0x2c4] sm:$0xf0]  ;;  %v1591_v19 = vor.u32 %v1885_v11, %v1590_v9  ;;  %v1867_v22 = vld [vmem:[#allocation7 + $0x1b4] sm:$0xf0]  ;;  %v1582_v24 = vld [vmem:[#allocation7 + $0x230] sm:$0xf] }
  0x36   :  { %1020 = vmatpush.bf16.msrb.mxu0 %v1487_v39  ;;  %328 = vmatmul.bf16.vlgmr.msra.gmra.mxu1 %v210_v60  ;;  %v2140_v14 = vld.sshfl [vmem:[#allocation1] sm:$0xff pattern:$0x73625140]  ;;  %v2142_v15 = vld.sshfl [vmem:[#allocation1 + $0x8] sm:$0xff pattern:$0x73625140]  ;;  %v1655_v23 = vor.u32 %v1901_v13, %v1654_v12  ;;  %v1519_v29 = vor.u32 %v1867_v22, %v1518_v21 }
  0x37   :  { %1033 = vmatpush.bf16.msrb.mxu1 %v1551_v40  ;;  %1002 = vmatmul.bf16.vlgmr.msra.gmra.mxu2 %v2140_v14  ;;  %v1883_v25 = vld [vmem:[#allocation7 + $0x234] sm:$0xf0]  ;;  %v1646_v26 = vld [vmem:[#allocation7 + $0x2b0] sm:$0xf]  ;;  %v1446_v30 = vld [vmem:[#allocation7 + $0x120] sm:$0xf] }
  0x38   :  { %1046 = vmatpush.bf16.msrb.mxu2 %v1615_v42  ;;  %1015 = vmatmul.bf16.vlgmr.msra.gmra.mxu3 %v2142_v15  ;;  %v1899_v27 = vld [vmem:[#allocation7 + $0x2b4] sm:$0xf0]  ;;  %v1849_v31 = vld [vmem:[#allocation7 + $0x124] sm:$0xf0]  ;;  %v1583_v32 = vor.u32 %v1883_v25, %v1582_v24  ;;  %v1510_v33 = vld [vmem:[#allocation7 + $0x1a0] sm:$0xf] }
  0x39   :  { %1059 = vmatpush.bf16.msrb.mxu3 %v1679_v47  ;;  %v1865_v34 = vld [vmem:[#allocation7 + $0x1a4] sm:$0xf0]  ;;  %v81_v35 = vld [vmem:[#allocation2 + $0x8] sm:$0xff]  ;;  %v1647_v36 = vor.u32 %v1899_v27, %v1646_v26  ;;  %v1574_v37 = vld [vmem:[#allocation7 + $0x220] sm:$0xf]  ;;  %v1447_v41 = vor.u32 %v1849_v31, %v1446_v30  ;;  %s1222_s14 = sshll.u32 %s2097_s13, 4  ;;  %s1223_s14 = int_to_ptr.vmem [resolvable:$true] %s1222_s14 }
  0x3a   :  { %1021 = vmatpush.bf16.msrb.mxu0 %v1479_v53  ;;  %v1881_v38 = vld [vmem:[#allocation7 + $0x224] sm:$0xf0]  ;;  %337 = vst [vmem:[#allocation1 + $0x20] ss:$4 sm:$0xff] %v81_v35  ;;  %v1638_v39 = vld [vmem:[#allocation7 + $0x2a0] sm:$0xf]  ;;  %v1511_v42 = vor.u32 %v1865_v34, %v1510_v33 }
  0x3b   :  { %1034 = vmatpush.bf16.msrb.mxu1 %v1543_v54  ;;  %v1897_v40 = vld [vmem:[#allocation7 + $0x2a4] sm:$0xf0]  ;;  %v1438_v43 = vld [vmem:[#allocation7 + $0x110] sm:$0xf]  ;;  %v1575_v44 = vor.u32 %v1881_v38, %v1574_v37  ;;  %v1847_v45 = vld [vmem:[#allocation7 + $0x114] sm:$0xf0] }
  0x3c   :  { %1047 = vmatpush.bf16.msrb.mxu2 %v1607_v57  ;;  %v1502_v46 = vld [vmem:[#allocation7 + $0x190] sm:$0xf]  ;;  %v1863_v47 = vld [vmem:[#allocation7 + $0x194] sm:$0xf0]  ;;  %v1639_v48 = vor.u32 %v1897_v40, %v1638_v39  ;;  %v1439_v53 = vor.u32 %v1847_v45, %v1438_v43  ;;  %v1430_v55 = vld [vmem:[#allocation7 + $0x100] sm:$0xf] }
  0x3d   :  { %1060 = vmatpush.bf16.msrb.mxu3 %v1671_v61  ;;  %v1566_v49 = vld [vmem:[#allocation7 + $0x210] sm:$0xf]  ;;  %v1879_v50 = vld [vmem:[#allocation7 + $0x214] sm:$0xf0]  ;;  %v1503_v54 = vor.u32 %v1863_v47, %v1502_v46  ;;  %v1845_v56 = vld [vmem:[#allocation7 + $0x104] sm:$0xf0] }
  0x3e   :  { %1022 = vmatpush.bf16.msrb.mxu0 %v1471_v2  ;;  %v1630_v51 = vld [vmem:[#allocation7 + $0x290] sm:$0xf]  ;;  %v1895_v52 = vld [vmem:[#allocation7 + $0x294] sm:$0xf0]  ;;  %v1494_v57 = vld [vmem:[#allocation7 + $0x180] sm:$0xf]  ;;  %v1567_v58 = vor.u32 %v1879_v50, %v1566_v49  ;;  %v1431_v5 = vor.u32 %v1845_v56, %v1430_v55 }
  0x3f   :  { %1035 = vmatpush.bf16.msrb.mxu1 %v1535_v3  ;;  %v1861_v59 = vld [vmem:[#allocation7 + $0x184] sm:$0xf0]  ;;  %v1558_v60 = vld [vmem:[#allocation7 + $0x200] sm:$0xf]  ;;  %v1631_v62 = vor.u32 %v1895_v52, %v1630_v51  ;;  %v1742_v63 = vld [vmem:[#allocation7 + $0x370] sm:$0xf] }
  0x40   :  { %1048 = vmatpush.bf16.msrb.mxu2 %v1599_v6  ;;  %v1877_v61 = vld [vmem:[#allocation7 + $0x204] sm:$0xf0]  ;;  %v1923_v0 = vld [vmem:[#allocation7 + $0x374] sm:$0xf0]  ;;  %v1806_v1 = vld [vmem:[#allocation7 + $0x3f0] sm:$0xf]  ;;  %v1495_v6 = vor.u32 %v1861_v59, %v1494_v57 }
  0x41   :  { %1061 = vmatpush.bf16.msrb.mxu3 %v1663_v10  ;;  %v1939_v2 = vld [vmem:[#allocation7 + $0x3f4] sm:$0xf0]  ;;  %v1826_v3 = vld [vmem:[#allocation7 + $0x74] sm:$0xf]  ;;  %v1360_v4 = vld [vmem:[#allocation7 + $0x78] sm:$0xf0]  ;;  %v1559_v9 = vor.u32 %v1877_v61, %v1558_v60  ;;  %v1743_v10 = vor.u32 %v1923_v0, %v1742_v63 }
  0x42   :  { %1023 = vmatpush.bf16.msrb.mxu0 %v1463_v16  ;;  %v1622_v7 = vld [vmem:[#allocation7 + $0x280] sm:$0xf]  ;;  %v1893_v8 = vld [vmem:[#allocation7 + $0x284] sm:$0xf0]  ;;  %v1842_v11 = vld [vmem:[#allocation7 + $0xf4] sm:$0xf]  ;;  %v1807_v13 = vor.u32 %v1939_v2, %v1806_v1  ;;  %v1363_v16 = vor.u32 %v1826_v3, %v1360_v4 }
  0x43   :  { %1036 = vmatpush.bf16.msrb.mxu1 %v1527_v17  ;;  %v1424_v12 = vld [vmem:[#allocation7 + $0xf8] sm:$0xf0]  ;;  %v1734_v18 = vld [vmem:[#allocation7 + $0x360] sm:$0xf]  ;;  %v1623_v21 = vor.u32 %v1893_v8, %v1622_v7  ;;  %v1937_v22 = vld [vmem:[#allocation7 + $0x3e4] sm:$0xf0] }
  0x44   :  { %1049 = vmatpush.bf16.msrb.mxu2 %v1591_v19  ;;  %v2146_v17 = vld.sshfl [vmem:[#allocation1 + $0x10] sm:$0xff pattern:$0x73625140]  ;;  %v1921_v19 = vld [vmem:[#allocation7 + $0x364] sm:$0xf0]  ;;  %v1427_v25 = vor.u32 %v1842_v11, %v1424_v12  ;;  %s1224_s17 = sshll.u32 %s2183_s5, 4  ;;  %s1225_s17 = int_to_ptr.hbm [resolvable:$true] %s1224_s17 }
  0x45   :  { %1062 = vmatpush.bf16.msrb.mxu3 %v1655_v23  ;;  %v1798_v20 = vld [vmem:[#allocation7 + $0x3e0] sm:$0xf]  ;;  %v1824_v23 = vld [vmem:[#allocation7 + $0x64] sm:$0xf]  ;;  %v1352_v24 = vld [vmem:[#allocation7 + $0x68] sm:$0xf0] }
  0x46   :  { %1024 = vmatpush.bf16.msrb.mxu0 %v1455_v28  ;;  %v2148_v26 = vld.sshfl [vmem:[#allocation1 + $0x18] sm:$0xff pattern:$0x73625140]  ;;  %v2150_v28 = vld.sshfl [vmem:[#allocation1 + $0x20] sm:$0xff pattern:$0x73625140]  ;;  %v1799_v31 = vor.u32 %v1937_v22, %v1798_v20 }
  0x47   :  { %1037 = vmatpush.bf16.msrb.mxu1 %v1519_v29  ;;  %v1840_v27 = vld [vmem:[#allocation7 + $0xe4] sm:$0xf]  ;;  %v1735_v29 = vor.u32 %v1921_v19, %v1734_v18  ;;  %v1416_v30 = vld [vmem:[#allocation7 + $0xe8] sm:$0xf0]  ;;  %v1919_v33 = vld [vmem:[#allocation7 + $0x354] sm:$0xf0] }
  0x48   :  { %1050 = vmatpush.bf16.msrb.mxu2 %v1583_v32  ;;  %v1726_v32 = vld [vmem:[#allocation7 + $0x350] sm:$0xf]  ;;  %v1935_v37 = vld [vmem:[#allocation7 + $0x3d4] sm:$0xf0]  ;;  %v1419_v38 = vor.u32 %v1840_v27, %v1416_v30  ;;  %v1822_v39 = vld [vmem:[#allocation7 + $0x54] sm:$0xf] }
  0x49   :  { %1063 = vmatpush.bf16.msrb.mxu3 %v1647_v36  ;;  %v1790_v34 = vld [vmem:[#allocation7 + $0x3d0] sm:$0xf]  ;;  %v1355_v36 = vor.u32 %v1824_v23, %v1352_v24  ;;  %v1344_v40 = vld [vmem:[#allocation7 + $0x58] sm:$0xf0]  ;;  %v1718_v45 = vld [vmem:[#allocation7 + $0x340] sm:$0xf] }
  0x4a   :  { %1025 = vmatpush.bf16.msrb.mxu0 %v1447_v41  ;;  %v2153_v35 = vld.sshfl [vmem:[#allocation1 + $0x28] sm:$0xff pattern:$0x73625140]  ;;  %v1727_v41 = vor.u32 %v1919_v33, %v1726_v32  ;;  %v1408_v43 = vld [vmem:[#allocation7 + $0xd8] sm:$0xf0]  ;;  %v1347_v47 = vor.u32 %v1822_v39, %v1344_v40  ;;  %vm1213_vm0 = vcmask 1043456  }
  0x4b   :  { %1038 = vmatpush.bf16.msrb.mxu1 %v1511_v42  ;;  %v1838_v42 = vld [vmem:[#allocation7 + $0xd4] sm:$0xf]  ;;  %v1917_v46 = vld [vmem:[#allocation7 + $0x344] sm:$0xf0]  ;;  %v1820_v51 = vld [vmem:[#allocation7 + $0x44] sm:$0xf] }
  0x4c   :  { %1051 = vmatpush.bf16.msrb.mxu2 %v1575_v44  ;;  %v1791_v44 = vor.u32 %v1935_v37, %v1790_v34  ;;  %v1933_v49 = vld [vmem:[#allocation7 + $0x3c4] sm:$0xf0]  ;;  %v1411_v50 = vor.u32 %v1838_v42, %v1408_v43  ;;  %v1336_v52 = vld [vmem:[#allocation7 + $0x48] sm:$0xf0]  ;;  %v1710_v57 = vld [vmem:[#allocation7 + $0x330] sm:$0xf] }
  0x4d   :  { %1064 = vmatpush.bf16.msrb.mxu3 %v1639_v48  ;;  %v1782_v48 = vld [vmem:[#allocation7 + $0x3c0] sm:$0xf]  ;;  %v1400_v55 = vld [vmem:[#allocation7 + $0xc8] sm:$0xf0]  ;;  %v1339_v59 = vor.u32 %v1820_v51, %v1336_v52  ;;  %v1774_v60 = vld [vmem:[#allocation7 + $0x3b0] sm:$0xf] }
  0x4e   :  { %1026 = vmatpush.bf16.msrb.mxu0 %v1439_v53  ;;  %v1719_v53 = vor.u32 %v1917_v46, %v1718_v45  ;;  %v1783_v56 = vor.u32 %v1933_v49, %v1782_v48  ;;  %v1931_v61 = vld [vmem:[#allocation7 + $0x3b4] sm:$0xf0]  ;;  %v1818_v63 = vld [vmem:[#allocation7 + $0x34] sm:$0xf]  ;;  %v1328_v0 = vld [vmem:[#allocation7 + $0x38] sm:$0xf0] }
  0x4f   :  { %1039 = vmatpush.bf16.msrb.mxu1 %v1503_v54  ;;  %v1836_v54 = vld [vmem:[#allocation7 + $0xc4] sm:$0xf]  ;;  %v1834_v2 = vld [vmem:[#allocation7 + $0xb4] sm:$0xf]  ;;  %v1392_v3 = vld [vmem:[#allocation7 + $0xb8] sm:$0xf0]  ;;  %v1775_v4 = vor.u32 %v1931_v61, %v1774_v60  ;;  %v1331_v7 = vor.u32 %v1818_v63, %v1328_v0 }
  0x50   :  { %1052 = vmatpush.bf16.msrb.mxu2 %v1567_v58  ;;  %v1915_v58 = vld [vmem:[#allocation7 + $0x334] sm:$0xf0]  ;;  %v1766_v8 = vld [vmem:[#allocation7 + $0x3a0] sm:$0xf]  ;;  %v1816_v11 = vld [vmem:[#allocation7 + $0x24] sm:$0xf] }
  0x51   :  { %1065 = vmatpush.bf16.msrb.mxu3 %v1631_v62  ;;  %v1403_v62 = vor.u32 %v1836_v54, %v1400_v55  ;;  %v1711_v1 = vor.u32 %v1915_v58, %v1710_v57  ;;  %v1320_v12 = vld [vmem:[#allocation7 + $0x28] sm:$0xf0]  ;;  %v1694_v20 = vld [vmem:[#allocation7 + $0x310] sm:$0xf]  ;;  %v1927_v24 = vld [vmem:[#allocation7 + $0x394] sm:$0xf0] }
  0x52   :  { %1027 = vmatpush.bf16.msrb.mxu0 %v1431_v5  ;;  %v1702_v5 = vld [vmem:[#allocation7 + $0x320] sm:$0xf]  ;;  %v1384_v18 = vld [vmem:[#allocation7 + $0xa8] sm:$0xf0]  ;;  %v1323_v22 = vor.u32 %v1816_v11, %v1320_v12  ;;  %v1758_v23 = vld [vmem:[#allocation7 + $0x390] sm:$0xf] }
  0x53   :  { %1040 = vmatpush.bf16.msrb.mxu1 %v1495_v6  ;;  %v1913_v6 = vld [vmem:[#allocation7 + $0x324] sm:$0xf0]  ;;  %v1814_v27 = vld [vmem:[#allocation7 + $0x14] sm:$0xf]  ;;  %v1376_v32 = vld [vmem:[#allocation7 + $0x98] sm:$0xf0] }
  0x54   :  { %1053 = vmatpush.bf16.msrb.mxu2 %v1559_v9  ;;  %v1929_v9 = vld [vmem:[#allocation7 + $0x3a4] sm:$0xf0]  ;;  %v1830_v30 = vld [vmem:[#allocation7 + $0x94] sm:$0xf]  ;;  %v1686_v33 = vld [vmem:[#allocation7 + $0x300] sm:$0xf] }
  0x55   :  { %1066 = vmatpush.bf16.msrb.mxu3 %v1623_v21  ;;  %1028 = vmatmul.bf16.vlgmr.msrb.gmra.mxu0 %v2146_v17  ;;  %v1767_v19 = vor.u32 %v1929_v9, %v1766_v8  ;;  %v1911_v21 = vld [vmem:[#allocation7 + $0x314] sm:$0xf0]  ;;  %v1909_v34 = vld [vmem:[#allocation7 + $0x304] sm:$0xf0]  ;;  %v1750_v37 = vld [vmem:[#allocation7 + $0x380] sm:$0xf] }
  0x56   :  { %1072 = vmatpush.bf16.msra.mxu0 %v1743_v10  ;;  %1041 = vmatmul.bf16.vlgmr.msrb.gmra.mxu1 %v2148_v26  ;;  %v1395_v10 = vor.u32 %v1834_v2, %v1392_v3  ;;  %v1812_v39 = vld [vmem:[#allocation7 + $0x4] sm:$0xf]  ;;  %v1858_v42 = vld [vmem:[#allocation7 + $0x174] sm:$0xf]  ;;  %v1488_v43 = vld [vmem:[#allocation7 + $0x178] sm:$0xf0]  ;;  %v1687_v48 = vor.u32 %v1909_v34, %v1686_v33 }
  0x57   :  { %1085 = vmatpush.bf16.msra.mxu1 %v1807_v13  ;;  %1054 = vmatmul.bf16.vlgmr.msrb.gmra.mxu2 %v2150_v28  ;;  %v1703_v13 = vor.u32 %v1913_v6, %v1702_v5  ;;  %v1874_v45 = vld [vmem:[#allocation7 + $0x1f4] sm:$0xf]  ;;  %v1552_v46 = vld [vmem:[#allocation7 + $0x1f8] sm:$0xf0]  ;;  %v1368_v51 = vld [vmem:[#allocation7 + $0x88] sm:$0xf0] }
  0x58   :  { %1098 = vmatpush.bf16.msra.mxu2 %v1363_v16  ;;  %1067 = vmatmul.bf16.vlgmr.msrb.gmra.mxu3 %v2153_v35  ;;  %v1832_v16 = vld [vmem:[#allocation7 + $0xa4] sm:$0xf]  ;;  %v1616_v49 = vld [vmem:[#allocation7 + $0x278] sm:$0xf0]  ;;  %v1906_v54 = vld [vmem:[#allocation7 + $0x2f4] sm:$0xf]  ;;  %v1555_v57 = vor.u32 %v1874_v45, %v1552_v46 }
  0x59   :  { %1111 = vmatpush.bf16.msra.mxu3 %v1427_v25  ;;  %v1387_v25 = vor.u32 %v1832_v16, %v1384_v18  ;;  %v1680_v55 = vld [vmem:[#allocation7 + $0x2f8] sm:$0xf0]  ;;  %v1856_v61 = vld [vmem:[#allocation7 + $0x164] sm:$0xf]  ;;  %v1608_v3 = vld [vmem:[#allocation7 + $0x268] sm:$0xf0] }
  0x5a   :  { %1073 = vmatpush.bf16.msra.mxu0 %v1735_v29  ;;  %v1312_v29 = vld [vmem:[#allocation7 + $0x18] sm:$0xf0]  ;;  %v1872_v63 = vld [vmem:[#allocation7 + $0x1e4] sm:$0xf]  ;;  %v1683_v0 = vor.u32 %v1906_v54, %v1680_v55  ;;  %v1672_v5 = vld [vmem:[#allocation7 + $0x2e8] sm:$0xf0] }
  0x5b   :  { %1086 = vmatpush.bf16.msra.mxu1 %v1799_v31  ;;  %v1695_v31 = vor.u32 %v1911_v21, %v1694_v20  ;;  %v1315_v40 = vor.u32 %v1814_v27, %v1312_v29  ;;  %v2158_v60 = vld.sshfl [vmem:[#allocation1 + $0x30] sm:$0xff pattern:$0x73625140]  ;;  %v1888_v2 = vld [vmem:[#allocation7 + $0x264] sm:$0xf] }
  0x5c   :  { %1099 = vmatpush.bf16.msra.mxu2 %v1355_v36  ;;  %v1759_v36 = vor.u32 %v1927_v24, %v1758_v23  ;;  %v2160_v6 = vld.sshfl [vmem:[#allocation1 + $0x38] sm:$0xff pattern:$0x73625140]  ;;  %v1611_v9 = vor.u32 %v1888_v2, %v1608_v3  ;;  %v1870_v12 = vld [vmem:[#allocation7 + $0x1d4] sm:$0xf] }
  0x5d   :  { %1112 = vmatpush.bf16.msra.mxu3 %v1419_v38  ;;  %v1925_v38 = vld [vmem:[#allocation7 + $0x384] sm:$0xf0]  ;;  %v1472_v11 = vld [vmem:[#allocation7 + $0x158] sm:$0xf0]  ;;  %v1886_v18 = vld [vmem:[#allocation7 + $0x254] sm:$0xf] }
  0x5e   :  { %1074 = vmatpush.bf16.msra.mxu0 %v1727_v41  ;;  %v1304_v41 = vld [vmem:[#allocation7 + $0x8] sm:$0xf0]  ;;  %v1751_v52 = vor.u32 %v1925_v38, %v1750_v37  ;;  %v1536_v16 = vld [vmem:[#allocation7 + $0x1d8] sm:$0xf0]  ;;  %v1902_v20 = vld [vmem:[#allocation7 + $0x2d4] sm:$0xf] }
  0x5f   :  { %1087 = vmatpush.bf16.msra.mxu1 %v1791_v44  ;;  %v1379_v44 = vor.u32 %v1830_v30, %v1376_v32  ;;  %v1664_v21 = vld [vmem:[#allocation7 + $0x2d8] sm:$0xf0]  ;;  %v1539_v23 = vor.u32 %v1870_v12, %v1536_v16  ;;  %v1464_v27 = vld [vmem:[#allocation7 + $0x148] sm:$0xf0]  ;;  %v1868_v29 = vld [vmem:[#allocation7 + $0x1c4] sm:$0xf] }
  0x60   :  { %1100 = vmatpush.bf16.msra.mxu2 %v1347_v47  ;;  %v1890_v47 = vld [vmem:[#allocation7 + $0x274] sm:$0xf]  ;;  %v1667_v30 = vor.u32 %v1902_v20, %v1664_v21  ;;  %v1884_v32 = vld [vmem:[#allocation7 + $0x244] sm:$0xf]  ;;  %v1656_v34 = vld [vmem:[#allocation7 + $0x2c8] sm:$0xf0] }
  0x61   :  { %1113 = vmatpush.bf16.msra.mxu3 %v1411_v50  ;;  %v1828_v50 = vld [vmem:[#allocation7 + $0x84] sm:$0xf]  ;;  %v1619_v58 = vor.u32 %v1890_v47, %v1616_v49  ;;  %v1850_v38 = vld [vmem:[#allocation7 + $0x134] sm:$0xf]  ;;  %v1648_v46 = vld [vmem:[#allocation7 + $0x2b8] sm:$0xf0] }
  0x62   :  { %1075 = vmatpush.bf16.msra.mxu0 %v1719_v53  ;;  %v1491_v53 = vor.u32 %v1858_v42, %v1488_v43  ;;  %v1900_v33 = vld [vmem:[#allocation7 + $0x2c4] sm:$0xf]  ;;  %v1520_v42 = vld [vmem:[#allocation7 + $0x1b8] sm:$0xf0]  ;;  %v1882_v43 = vld [vmem:[#allocation7 + $0x234] sm:$0xf] }
  0x63   :  { %1088 = vmatpush.bf16.msra.mxu1 %v1783_v56  ;;  %v1307_v56 = vor.u32 %v1812_v39, %v1304_v41  ;;  %v1456_v39 = vld [vmem:[#allocation7 + $0x138] sm:$0xf0]  ;;  %v1659_v41 = vor.u32 %v1900_v33, %v1656_v34  ;;  %v1898_v45 = vld [vmem:[#allocation7 + $0x2b4] sm:$0xf]  ;;  %v1512_v54 = vld [vmem:[#allocation7 + $0x1a8] sm:$0xf0] }
  0x64   :  { %1101 = vmatpush.bf16.msra.mxu2 %v1339_v59  ;;  %v1371_v59 = vor.u32 %v1828_v50, %v1368_v51  ;;  %v1459_v47 = vor.u32 %v1850_v38, %v1456_v39  ;;  %v1848_v50 = vld [vmem:[#allocation7 + $0x124] sm:$0xf]  ;;  %v1448_v51 = vld [vmem:[#allocation7 + $0x128] sm:$0xf0]  ;;  %v1504_v3 = vld [vmem:[#allocation7 + $0x198] sm:$0xf0] }
  0x65   :  { %1114 = vmatpush.bf16.msra.mxu3 %v1403_v62  ;;  %v1480_v62 = vld [vmem:[#allocation7 + $0x168] sm:$0xf0]  ;;  %v1880_v55 = vld [vmem:[#allocation7 + $0x224] sm:$0xf] }
  0x66   :  { %1076 = vmatpush.bf16.msra.mxu0 %v1711_v1  ;;  %v1544_v1 = vld [vmem:[#allocation7 + $0x1e8] sm:$0xf0]  ;;  %v1860_v16 = vld [vmem:[#allocation7 + $0x184] sm:$0xf] }
  0x67   :  { %1089 = vmatpush.bf16.msra.mxu1 %v1775_v4  ;;  %v1904_v4 = vld [vmem:[#allocation7 + $0x2e4] sm:$0xf]  ;;  %v1547_v8 = vor.u32 %v1872_v63, %v1544_v1  ;;  %v1846_v63 = vld [vmem:[#allocation7 + $0x114] sm:$0xf]  ;;  %v1560_v21 = vld [vmem:[#allocation7 + $0x208] sm:$0xf0] }
  0x68   :  { %1102 = vmatpush.bf16.msra.mxu2 %v1331_v7  ;;  %v1483_v7 = vor.u32 %v1856_v61, %v1480_v62  ;;  %v1862_v1 = vld [vmem:[#allocation7 + $0x194] sm:$0xf]  ;;  %v1876_v20 = vld [vmem:[#allocation7 + $0x204] sm:$0xf]  ;;  %v1800_v38 = vld [vmem:[#allocation7 + $0x3e8] sm:$0xf0] }
  0x69   :  { %1115 = vmatpush.bf16.msra.mxu3 %v1395_v10  ;;  %v1854_v10 = vld [vmem:[#allocation7 + $0x154] sm:$0xf] }
  0x6a   :  { %1077 = vmatpush.bf16.msra.mxu0 %v1703_v13  ;;  %v1675_v13 = vor.u32 %v1904_v4, %v1672_v5  ;;  %v1878_v4 = vld [vmem:[#allocation7 + $0x214] sm:$0xf]  ;;  %v1568_v5 = vld [vmem:[#allocation7 + $0x218] sm:$0xf0] }
  0x6b   :  { %1090 = vmatpush.bf16.msra.mxu1 %v1767_v19  ;;  %v1600_v19 = vld [vmem:[#allocation7 + $0x258] sm:$0xf0]  ;;  %v1571_v12 = vor.u32 %v1878_v4, %v1568_v5  ;;  %v1908_v4 = vld [vmem:[#allocation7 + $0x304] sm:$0xf]  ;;  %v1688_v5 = vld [vmem:[#allocation7 + $0x308] sm:$0xf0] }
  0x6c   :  { %1103 = vmatpush.bf16.msra.mxu2 %v1323_v22  ;;  %v1475_v22 = vor.u32 %v1854_v10, %v1472_v11  ;;  %v1603_v24 = vor.u32 %v1886_v18, %v1600_v19  ;;  %v1844_v10 = vld [vmem:[#allocation7 + $0x104] sm:$0xf]  ;;  %v1507_v11 = vor.u32 %v1862_v1, %v1504_v3  ;;  %v1496_v18 = vld [vmem:[#allocation7 + $0x188] sm:$0xf0]  ;;  %v1760_v1 = vld [vmem:[#allocation7 + $0x398] sm:$0xf0] }
  0x6d   :  { %1116 = vmatpush.bf16.msra.mxu3 %v1387_v25  ;;  %v1852_v25 = vld [vmem:[#allocation7 + $0x144] sm:$0xf] }
  0x6e   :  { %1078 = vmatpush.bf16.msra.mxu0 %v1695_v31  ;;  %v1528_v31 = vld [vmem:[#allocation7 + $0x1c8] sm:$0xf0] }
  0x6f   :  { %1091 = vmatpush.bf16.msra.mxu1 %v1759_v36  ;;  %v1467_v36 = vor.u32 %v1852_v25, %v1464_v27  ;;  %v1808_v25 = vld [vmem:[#allocation7 + $0x3f8] sm:$0xf0] }
  0x70   :  { %1104 = vmatpush.bf16.msra.mxu2 %v1315_v40  ;;  %v1866_v40 = vld [vmem:[#allocation7 + $0x1b4] sm:$0xf] }
  0x71   :  { %1117 = vmatpush.bf16.msra.mxu3 %v1379_v44  ;;  %v1584_v44 = vld [vmem:[#allocation7 + $0x238] sm:$0xf0] }
  0x72   :  { %1079 = vmatpush.bf16.msra.mxu0 %v1687_v48  ;;  %v1523_v48 = vor.u32 %v1866_v40, %v1520_v42  ;;  %v1587_v49 = vor.u32 %v1882_v43, %v1584_v44  ;;  %v1728_v42 = vld [vmem:[#allocation7 + $0x358] sm:$0xf0]  ;;  %v1934_v43 = vld [vmem:[#allocation7 + $0x3d4] sm:$0xf] }
  0x73   :  { %1092 = vmatpush.bf16.msra.mxu1 %v1751_v52  ;;  %v1864_v52 = vld [vmem:[#allocation7 + $0x1a4] sm:$0xf]  ;;  %v1792_v44 = vld [vmem:[#allocation7 + $0x3d8] sm:$0xf0] }
  0x74   :  { %1105 = vmatpush.bf16.msra.mxu2 %v1307_v56  ;;  %v1576_v56 = vld [vmem:[#allocation7 + $0x228] sm:$0xf0]  ;;  %v1515_v61 = vor.u32 %v1864_v52, %v1512_v54  ;;  %v1914_v52 = vld [vmem:[#allocation7 + $0x334] sm:$0xf] }
  0x75   :  { %1118 = vmatpush.bf16.msra.mxu3 %v1371_v59  ;;  %1080 = vmatmul.bf16.vlgmr.msra.gmra.mxu0 %v2158_v60  ;;  %v1451_v59 = vor.u32 %v1848_v50, %v1448_v51  ;;  %v1579_v62 = vor.u32 %v1880_v55, %v1576_v56  ;;  %v1784_v50 = vld [vmem:[#allocation7 + $0x3c8] sm:$0xf0]  ;;  %v1912_v55 = vld [vmem:[#allocation7 + $0x324] sm:$0xf] }
  0x76   :  { %1124 = vmatpush.bf16.msrb.mxu0 %v1491_v53  ;;  %1093 = vmatmul.bf16.vlgmr.msra.gmra.mxu1 %v2160_v6  ;;  %v1651_v53 = vor.u32 %v1898_v45, %v1648_v46  ;;  %v1795_v46 = vor.u32 %v1934_v43, %v1792_v44  ;;  %v1704_v56 = vld [vmem:[#allocation7 + $0x328] sm:$0xf0] }
  0x77   :  { %1137 = vmatpush.bf16.msrb.mxu1 %v1555_v57  ;;  %1106 = vmatmul.bf16.vlgmr.msra.gmra.mxu2 %v2140_v14  ;;  %v1592_v14 = vld [vmem:[#allocation7 + $0x248] sm:$0xf0]  ;;  %v1896_v57 = vld [vmem:[#allocation7 + $0x2a4] sm:$0xf] }
  0x78   :  { %1150 = vmatpush.bf16.msrb.mxu2 %v1619_v58  ;;  %1119 = vmatmul.bf16.vlgmr.msra.gmra.mxu3 %v2142_v15  ;;  %v1531_v15 = vor.u32 %v1868_v29, %v1528_v31  ;;  %v1595_v37 = vor.u32 %v1884_v32, %v1592_v14  ;;  %v1640_v58 = vld [vmem:[#allocation7 + $0x2a8] sm:$0xf0]  ;;  %v1892_v29 = vld [vmem:[#allocation7 + $0x284] sm:$0xf]  ;;  %v1499_v31 = vor.u32 %v1860_v16, %v1496_v18 }
  0x79   :  { %1163 = vmatpush.bf16.msrb.mxu3 %v1683_v0  ;;  %v1440_v0 = vld [vmem:[#allocation7 + $0x118] sm:$0xf0]  ;;  %v1643_v2 = vor.u32 %v1896_v57, %v1640_v58  ;;  %v1563_v32 = vor.u32 %v1876_v20, %v1560_v21  ;;  %v1928_v57 = vld [vmem:[#allocation7 + $0x3a4] sm:$0xf]  ;;  %v1768_v58 = vld [vmem:[#allocation7 + $0x3a8] sm:$0xf0] }
  0x7a   :  { %1125 = vmatpush.bf16.msrb.mxu0 %v1483_v7  ;;  %v1894_v7 = vld [vmem:[#allocation7 + $0x294] sm:$0xf] }
  0x7b   :  { %1138 = vmatpush.bf16.msrb.mxu1 %v1547_v8  ;;  %v1632_v8 = vld [vmem:[#allocation7 + $0x298] sm:$0xf0] }
  0x7c   :  { %1151 = vmatpush.bf16.msrb.mxu2 %v1611_v9  ;;  %v1443_v9 = vor.u32 %v1846_v63, %v1440_v0  ;;  %v1635_v19 = vor.u32 %v1894_v7, %v1632_v8  ;;  %v1696_v63 = vld [vmem:[#allocation7 + $0x318] sm:$0xf0]  ;;  %v1926_v0 = vld [vmem:[#allocation7 + $0x394] sm:$0xf]  ;;  %v1924_v7 = vld [vmem:[#allocation7 + $0x384] sm:$0xf] }
  0x7d   :  { %1164 = vmatpush.bf16.msrb.mxu3 %v1675_v13  ;;  %v1432_v13 = vld [vmem:[#allocation7 + $0x108] sm:$0xf0]  ;;  %v1763_v3 = vor.u32 %v1926_v0, %v1760_v1 }
  0x7e   :  { %1126 = vmatpush.bf16.msrb.mxu0 %v1475_v22  ;;  %v1922_v22 = vld [vmem:[#allocation7 + $0x374] sm:$0xf]  ;;  %v1435_v27 = vor.u32 %v1844_v10, %v1432_v13  ;;  %v1752_v8 = vld [vmem:[#allocation7 + $0x388] sm:$0xf0] }
  0x7f   :  { %1139 = vmatpush.bf16.msrb.mxu1 %v1539_v23  ;;  %v1744_v23 = vld [vmem:[#allocation7 + $0x378] sm:$0xf0]  ;;  %v1755_v10 = vor.u32 %v1924_v7, %v1752_v8 }
  0x80   :  { %1152 = vmatpush.bf16.msrb.mxu2 %v1603_v24  ;;  %v1938_v24 = vld [vmem:[#allocation7 + $0x3f4] sm:$0xf]  ;;  %v1747_v14 = vor.u32 %v1922_v22, %v1744_v23 }
  0x81   :  { %1165 = vmatpush.bf16.msrb.mxu3 %v1667_v30  ;;  %v1624_v30 = vld [vmem:[#allocation7 + $0x288] sm:$0xf0]  ;;  %v1811_v33 = vor.u32 %v1938_v24, %v1808_v25 }
  0x82   :  { %1127 = vmatpush.bf16.msrb.mxu0 %v1467_v36  ;;  %v1627_v34 = vor.u32 %v1892_v29, %v1624_v30  ;;  %v1920_v36 = vld [vmem:[#allocation7 + $0x364] sm:$0xf] }
  0x83   :  { %1140 = vmatpush.bf16.msrb.mxu1 %v1531_v15  ;;  %v1736_v15 = vld [vmem:[#allocation7 + $0x368] sm:$0xf0] }
  0x84   :  { %1153 = vmatpush.bf16.msrb.mxu2 %v1595_v37  ;;  %v1936_v37 = vld [vmem:[#allocation7 + $0x3e4] sm:$0xf]  ;;  %v1739_v39 = vor.u32 %v1920_v36, %v1736_v15 }
  0x85   :  { %1166 = vmatpush.bf16.msrb.mxu3 %v1659_v41  ;;  %v1803_v40 = vor.u32 %v1936_v37, %v1800_v38  ;;  %v1918_v41 = vld [vmem:[#allocation7 + $0x354] sm:$0xf] }
  0x86   :  { %1128 = vmatpush.bf16.msrb.mxu0 %v1459_v47  ;;  %v1731_v45 = vor.u32 %v1918_v41, %v1728_v42  ;;  %v1916_v47 = vld [vmem:[#allocation7 + $0x344] sm:$0xf] }
  0x87   :  { %1141 = vmatpush.bf16.msrb.mxu1 %v1523_v48  ;;  %v1720_v48 = vld [vmem:[#allocation7 + $0x348] sm:$0xf0] }
  0x88   :  { %1154 = vmatpush.bf16.msrb.mxu2 %v1587_v49  ;;  %v1932_v49 = vld [vmem:[#allocation7 + $0x3c4] sm:$0xf] }
  0x89   :  { %1167 = vmatpush.bf16.msrb.mxu3 %v1651_v53  ;;  %v1787_v51 = vor.u32 %v1932_v49, %v1784_v50  ;;  %v1930_v53 = vld [vmem:[#allocation7 + $0x3b4] sm:$0xf] }
  0x8a   :  { %1129 = vmatpush.bf16.msrb.mxu0 %v1451_v59  ;;  %v1707_v59 = vor.u32 %v1912_v55, %v1704_v56 }
  0x8b   :  { %1142 = vmatpush.bf16.msrb.mxu1 %v1515_v61  ;;  %v1771_v61 = vor.u32 %v1928_v57, %v1768_v58 }
  0x8c   :  { %1155 = vmatpush.bf16.msrb.mxu2 %v1579_v62  ;;  %v1910_v62 = vld [vmem:[#allocation7 + $0x314] sm:$0xf] }
  0x8d   :  { %1168 = vmatpush.bf16.msrb.mxu3 %v1643_v2  ;;  %v1699_v2 = vor.u32 %v1910_v62, %v1696_v63 }
  0x8e   :  { %1130 = vmatpush.bf16.msrb.mxu0 %v1443_v9  ;;  %v1691_v9 = vor.u32 %v1908_v4, %v1688_v5 }
  0x8f   :  { %1143 = vmatpush.bf16.msrb.mxu1 %v1507_v11 }
  0x90   :  { %1156 = vmatpush.bf16.msrb.mxu2 %v1571_v12 }
  0x91   :  { %1169 = vmatpush.bf16.msrb.mxu3 %v1635_v19 }
  0x92   :  { %1131 = vmatpush.bf16.msrb.mxu0 %v1435_v27 }
  0x93   :  { %1144 = vmatpush.bf16.msrb.mxu1 %v1499_v31 }
  0x94   :  { %1157 = vmatpush.bf16.msrb.mxu2 %v1563_v32 }
  0x95   :  { %1170 = vmatpush.bf16.msrb.mxu3 %v1627_v34  ;;  %1132 = vmatmul.bf16.vlgmr.msrb.gmra.mxu0 %v2146_v17  ;;  %v1723_v17 = vor.u32 %v1916_v47, %v1720_v48 }
  0x96   :  { %1176 = vmatpush.bf16.msra.mxu0 %v1747_v14  ;;  %1145 = vmatmul.bf16.vlgmr.msrb.gmra.mxu1 %v2148_v26  ;;  %v1776_v26 = vld [vmem:[#allocation7 + $0x3b8] sm:$0xf0] }
  0x97   :  { %1189 = vmatpush.bf16.msra.mxu1 %v1811_v33  ;;  %1158 = vmatmul.bf16.vlgmr.msrb.gmra.mxu2 %v2150_v28  ;;  %v1712_v28 = vld [vmem:[#allocation7 + $0x338] sm:$0xf0] }
  0x98   :  { %1171 = vmatmul.bf16.vlgmr.msrb.gmra.mxu3 %v2153_v35  ;;  %v1715_v54 = vor.u32 %v1914_v52, %v1712_v28  ;;  %v1779_v35 = vor.u32 %v1930_v53, %v1776_v26 }
  0x9a   :  { %1177 = vmatpush.bf16.msra.mxu0 %v1739_v39 }
  0x9b   :  { %1190 = vmatpush.bf16.msra.mxu1 %v1803_v40 }
  0x9e   :  { %1178 = vmatpush.bf16.msra.mxu0 %v1731_v45 }
  0x9f   :  { %1191 = vmatpush.bf16.msra.mxu1 %v1795_v46 }
  0xa2   :  { %1179 = vmatpush.bf16.msra.mxu0 %v1723_v17 }
  0xa3   :  { %1192 = vmatpush.bf16.msra.mxu1 %v1787_v51 }
  0xa6   :  { %1180 = vmatpush.bf16.msra.mxu0 %v1715_v54 }
  0xa7   :  { %1193 = vmatpush.bf16.msra.mxu1 %v1779_v35  ;;  %v1202_v35 = vld [vmem:[%s2182_s4] sm:$0x3] }
  0xa8   :  { %v1205_v58 = vperm.slane %v1202_v35, 1 }
  0xaa   :  { %1181 = vmatpush.bf16.msra.mxu0 %v1707_v59 }
  0xab   :  { %1194 = vmatpush.bf16.msra.mxu1 %v1771_v61  ;;  %v1204_v61 = vperm.slane %v1202_v35, 0 }
  0xae   :  { %1182 = vmatpush.bf16.msra.mxu0 %v1699_v2 }
  0xaf   :  { %1195 = vmatpush.bf16.msra.mxu1 %v1763_v3 }
  0xb2   :  { %1183 = vmatpush.bf16.msra.mxu0 %v1691_v9  ;;  %v316_v11 = vpop.f32.mrf.mxu0 }
  0xb3   :  { %1196 = vmatpush.bf16.msra.mxu1 %v1755_v10  ;;  %v329_v12 = vpop.f32.mrf.mxu1 }
  0xb5   :  { %1184 = vmatmul.bf16.vlgmr.msra.gmra.mxu0 %v2158_v60 }
  0xb6   :  { %1197 = vmatmul.bf16.vlgmr.msra.gmra.mxu1 %v2160_v6 }
  0xba   :  { %v318_v13 = vpop.f32.mrf.mxu0  ;;  %v1003_v19 = vpop.f32.mrf.mxu2 }
  0xbb   :  { %v331_v16 = vpop.f32.mrf.mxu1  ;;  %v1016_v18 = vpop.f32.mrf.mxu3  ;;  %v1004_v20 = vadd.f32 %v1003_v19, %v316_v11 }
  0xbd   :  { %v1017_v21 = vadd.f32 %v1016_v18, %v1004_v20 }
  0xc2   :  { %v1005_v23 = vpop.f32.mrf.mxu2 }
  0xc3   :  { %v1018_v22 = vpop.f32.mrf.mxu3 }
  0xd2   :  { %v1029_v24 = vpop.f32.mrf.mxu0 }
  0xd3   :  { %v1030_v25 = vadd.f32 %v1029_v24, %v1017_v21  ;;  %v1042_v27 = vpop.f32.mrf.mxu1 }
  0xd5   :  { %v1043_v29 = vadd.f32 %v1042_v27, %v1030_v25 }
  0xda   :  { %v1055_v30 = vpop.f32.mrf.mxu2  ;;  %v1031_v32 = vpop.f32.mrf.mxu0 }
  0xdb   :  { %v1056_v31 = vadd.f32 %v1055_v30, %v1043_v29  ;;  %v1068_v60 = vpop.f32.mrf.mxu3  ;;  %v1044_v6 = vpop.f32.mrf.mxu1 }
  0xdd   :  { %v1069_v14 = vadd.f32 %v1068_v60, %v1056_v31 }
  0xe2   :  { %v1057_v33 = vpop.f32.mrf.mxu2 }
  0xe3   :  { %v1070_v34 = vpop.f32.mrf.mxu3 }
  0xf2   :  { %v1081_v36 = vpop.f32.mrf.mxu0 }
  0xf3   :  { %v1094_v15 = vpop.f32.mrf.mxu1  ;;  %v1082_v26 = vadd.f32 %v1081_v36, %v1069_v14 }
  0xf5   :  { %v1095_v59 = vadd.f32 %v1094_v15, %v1082_v26 }
  0xf7   :  { %v1208_v0 = vadd.f32 %v1204_v61, %v1095_v59 }
  0xfa   :  { %v1107_v37 = vpop.f32.mrf.mxu2  ;;  %v1083_v39 = vpop.f32.mrf.mxu0 }
  0xfb   :  { %v1120_v38 = vpop.f32.mrf.mxu3  ;;  %v1096_v40 = vpop.f32.mrf.mxu1  ;;  %v1108_v49 = vadd.f32 %v1107_v37, %v329_v12 }
  0xfd   :  { %v1121_v17 = vadd.f32 %v1120_v38, %v1108_v49 }
 0x102   :  { %v1109_v41 = vpop.f32.mrf.mxu2 }
 0x103   :  { %v1122_v42 = vpop.f32.mrf.mxu3 }
 0x112   :  { %v1133_v43 = vpop.f32.mrf.mxu0 }
 0x113   :  { %v1146_v44 = vpop.f32.mrf.mxu1  ;;  %v1134_v52 = vadd.f32 %v1133_v43, %v1121_v17 }
 0x115   :  { %v1147_v28 = vadd.f32 %v1146_v44, %v1134_v52 }
 0x11a   :  { %v1159_v45 = vpop.f32.mrf.mxu2  ;;  %v1135_v46 = vpop.f32.mrf.mxu0 }
 0x11b   :  { %v1172_v47 = vpop.f32.mrf.mxu3  ;;  %v1148_v48 = vpop.f32.mrf.mxu1  ;;  %v1160_v53 = vadd.f32 %v1159_v45, %v1147_v28 }
 0x11d   :  { %v1173_v54 = vadd.f32 %v1172_v47, %v1160_v53 }
 0x122   :  { %v1161_v50 = vpop.f32.mrf.mxu2 }
 0x123   :  { %v1174_v51 = vpop.f32.mrf.mxu3 }
 0x132   :  { %v1185_v55 = vpop.f32.mrf.mxu0 }
 0x133   :  { %v1186_v56 = vadd.f32 %v1185_v55, %v1173_v54  ;;  %v1198_v57 = vpop.f32.mrf.mxu1 }
 0x135   :  { %v1199_v62 = vadd.f32 %v1198_v57, %v1186_v56 }
 0x137   :  { %v1209_v63 = vadd.f32 %v1205_v58, %v1199_v62 }
 0x139   :  { %v1212_v1 = vrot.slane %v1209_v63, 4 }
 0x13a   :  { %v1187_v2 = vpop.f32.mrf.mxu0 }
 0x13b   :  { %v1200_v3 = vpop.f32.mrf.mxu1  ;;  %v1214_v4 = vsel %vm1213_vm0, %v1208_v0, %v1212_v1 }
 0x13c   :  { %1216 = vst [vmem:[#allocation10] sm:$0xff] %v1214_v4 }
 0x13d   :  { %1227 = dma.vmem_to_hbm [thread:$0]  %s1223_s14, 128, %s1225_s17, [#allocation4]  }
 0x13e   :  { %2089 = dma.done.wait [#allocation4], 128  }
 0x13f   :  { %2090 = vsyncadd [#allocation4], 4294967168 }
 0x140   :  { %1232 = vsyncpa [#allocation3], 1 }
 0x141   :  { %1233 = vsyncpa [#allocation6], 1 }
 0x142   :  { %1234 = vsyncpa [#allocation9], 1 }
 0x143   :  { %1235 = vsyncpa [#allocation4], 1 }

</bundles_post_ra>
